<compile_context>
chip_gen: v7x
topology: tpu7x:2x2x1
jax: 0.10.0
libtpu: 0.0.40
codegen_flags: <defaults>
</compile_context>

<pallas_src>
import functools

import jax
import jax.numpy as jnp
from jax.experimental import pallas as pl
from jax.experimental.pallas import tpu as pltpu

_EPS = 1e-8
# Safe scoped-VMEM request on every generation (v5e/v6e: 128 MiB physical,
# v7x: 64 MiB physical) while comfortably above v5e's 16 MiB default.
_VMEM_LIMIT_BYTES = 32 * 1024 * 1024


# ----------------------------------------------------------------------------
# Kernels
# ----------------------------------------------------------------------------
def _normalize_rows_kernel(x_ref, o_ref):
    """Single-pass path: one (TM, L) slab; per-row min/max of |x| + normalize."""
    x = x_ref[...].astype(jnp.float32)
    xa = jnp.abs(x)
    mn = jnp.min(xa, axis=-1, keepdims=True)
    mx = jnp.max(xa, axis=-1, keepdims=True)
    # One (exact) reciprocal per row + one multiply per element instead of a
    # per-element divide.  approx=True would break the <=1e-5 match vs. the
    # exact-divide reference, so we keep the exact reciprocal.
    inv = pl.reciprocal(mx - mn + jnp.float32(_EPS), approx=False)
    o_ref[...] = ((x - mn) * inv).astype(o_ref.dtype)


def _minmax_chunk_kernel(x_ref, mn_ref, mx_ref, *, chunk_cols, valid_cols):
    """Chunked path, pass 1: accumulate per-row min/max of |x| over spatial chunks."""
    k = pl.program_id(1)

    @pl.when(k == 0)
    def _():
        mn_ref[...] = jnp.full_like(mn_ref, jnp.inf)
        mx_ref[...] = jnp.full_like(mx_ref, -jnp.inf)

    xa = jnp.abs(x_ref[...].astype(jnp.float32))
    # Mask out-of-range columns of a ragged last chunk so they cannot corrupt
    # the per-row min/max (+inf is neutral for min, -inf for max).
    col = jax.lax.broadcasted_iota(jnp.int32, xa.shape, 1) + k * chunk_cols
    in_bounds = col < valid_cols
    mn_ref[...] = jnp.minimum(
        mn_ref[...],
        jnp.min(jnp.where(in_bounds, xa, jnp.inf), axis=-1, keepdims=True))
    mx_ref[...] = jnp.maximum(
        mx_ref[...],
        jnp.max(jnp.where(in_bounds, xa, -jnp.inf), axis=-1, keepdims=True))


def _apply_chunk_kernel(x_ref, mn_ref, mx_ref, o_ref):
    """Chunked path, pass 2: normalize one (TM, TL) tile with per-row min/max."""
    x = x_ref[...].astype(jnp.float32)
    mn = mn_ref[...]
    inv = pl.reciprocal(mx_ref[...] - mn + jnp.float32(_EPS), approx=False)
    o_ref[...] = ((x - mn) * inv).astype(o_ref.dtype)


# ----------------------------------------------------------------------------
# Wrappers
# ----------------------------------------------------------------------------
def _pick_tm(r: int, row_bytes: int, target_block_bytes: int) -> int:
    """Rows per block: a multiple of 8 (sublane tile) or the full row count."""
    tm = max(1, target_block_bytes // max(row_bytes, 1))
    # Keep >= 2 grid steps when possible so v7x's two TensorCores both get a
    # share of the "parallel" grid axis.
    tm = min(tm, max(8, r // 2))
    tm = (tm // 8) * 8
    if tm < 8:
        return r if r < 8 else 8
    return tm if tm < r else r


def _normalize_single_pass(x2: jax.Array, target_block_bytes: int) -> jax.Array:
    r, l = x2.shape
    itemsize = x2.dtype.itemsize
    tm = _pick_tm(r, l * itemsize, target_block_bytes)
    cost = pl.CostEstimate(flops=5 * r * l, transcendentals=0,
                           bytes_accessed=2 * r * l * itemsize)
    return pl.pallas_call(
        _normalize_rows_kernel,
        out_shape=jax.ShapeDtypeStruct((r, l), x2.dtype),
        grid=(pl.cdiv(r, tm),),
        in_specs=[pl.BlockSpec((tm, l), lambda i: (i, 0))],
        out_specs=pl.BlockSpec((tm, l), lambda i: (i, 0)),
        compiler_params=pltpu.CompilerParams(
            dimension_semantics=("parallel",),
            vmem_limit_bytes=_VMEM_LIMIT_BYTES),
        cost_estimate=cost,
    )(x2)


def _normalize_two_pass(x2: jax.Array, target_block_bytes: int) -> jax.Array:
    """For huge H*W slabs that would blow VMEM: chunked reduce, then normalize."""
    r, l = x2.shape
    itemsize = x2.dtype.itemsize
    tm = r if r < 8 else 8
    tl = max(128, (target_block_bytes // max(tm * itemsize, 1)) // 128 * 128)
    if tl >= l:  # whole row fits in one chunk -> single-pass is simpler/faster
        return _normalize_single_pass(x2, target_block_bytes)
    grid = (pl.cdiv(r, tm), pl.cdiv(l, tl))

    mn, mx = pl.pallas_call(
        functools.partial(_minmax_chunk_kernel, chunk_cols=tl, valid_cols=l),
        out_shape=[jax.ShapeDtypeStruct((r, 1), jnp.float32),
                   jax.ShapeDtypeStruct((r, 1), jnp.float32)],
        grid=grid,
        in_specs=[pl.BlockSpec((tm, tl), lambda i, k: (i, k))],
        out_specs=[pl.BlockSpec((tm, 1), lambda i, k: (i, 0)),
                   pl.BlockSpec((tm, 1), lambda i, k: (i, 0))],
        compiler_params=pltpu.CompilerParams(
            dimension_semantics=("parallel", "arbitrary"),
            vmem_limit_bytes=_VMEM_LIMIT_BYTES),
        cost_estimate=pl.CostEstimate(flops=3 * r * l, transcendentals=0,
                                      bytes_accessed=r * l * itemsize + 8 * r),
    )(x2)

    return pl.pallas_call(
        _apply_chunk_kernel,
        out_shape=jax.ShapeDtypeStruct((r, l), x2.dtype),
        grid=grid,
        in_specs=[pl.BlockSpec((tm, tl), lambda i, k: (i, k)),
                  pl.BlockSpec((tm, 1), lambda i, k: (i, 0)),
                  pl.BlockSpec((tm, 1), lambda i, k: (i, 0))],
        out_specs=pl.BlockSpec((tm, tl), lambda i, k: (i, k)),
        compiler_params=pltpu.CompilerParams(
            dimension_semantics=("parallel", "parallel"),
            vmem_limit_bytes=_VMEM_LIMIT_BYTES),
        cost_estimate=pl.CostEstimate(flops=3 * r * l, transcendentals=0,
                                      bytes_accessed=2 * r * l * itemsize + 8 * r),
    )(x2, mn, mx)


def normalize_one_sample(x: jax.Array,
                         *,
                         target_block_bytes: int = 2 * 1024 * 1024,
                         single_pass_limit_bytes: int = 4 * 1024 * 1024) -> jax.Array:
    """(x - min|x|) / (max|x| - min|x| + 1e-8), min/max per (n, c) slice.

    Note: the PyTorch module mutates x in place; JAX is functional, so a new
    array with identical values is returned.
    """
    assert x.ndim == 4
    n, c, h, w = x.shape
    r, l = n * c, h * w
    itemsize = jnp.dtype(x.dtype).itemsize
    x2 = x.reshape(r, l)  # lane-dense (rows, H*W) layout; free for NCHW input

    if min(r, 8) * l * itemsize <= single_pass_limit_bytes:
        out2 = _normalize_single_pass(x2, target_block_bytes)
    else:
        out2 = _normalize_two_pass(x2, target_block_bytes)
    return out2.reshape(n, c, h, w)


# ----------------------------------------------------------------------------
# Reference + test
# ----------------------------------------------------------------------------
def _reference(x: jax.Array) -> jax.Array:
    xa = jnp.abs(x).reshape(x.shape[0], x.shape[1], -1)
    mn = xa.min(axis=-1)[:, :, None, None]
    mx = xa.max(axis=-1)[:, :, None, None]
    return ((x - mn) / (mx - mn + 1e-8)).astype(x.dtype)


if __name__ == "__main__":
    key = jax.random.PRNGKey(0)
    x = jax.random.normal(key, (2, 4, 16, 16), dtype=jnp.float32)

    out = jax.block_until_ready(normalize_one_sample(x))
    ref = _reference(x)
    assert out.shape == ref.shape and out.dtype == ref.dtype
    assert jnp.allclose(out, ref, atol=1e-5, rtol=1e-5)

    # Also exercise the chunked two-pass fallback (including the ragged last
    # spatial chunk masking) by forcing a tiny per-block budget.
    x2 = jax.random.normal(jax.random.PRNGKey(1), (2, 4, 16, 20), dtype=jnp.float32)
    out2 = jax.block_until_ready(
        normalize_one_sample(x2, target_block_bytes=4096, single_pass_limit_bytes=0))
    ref2 = _reference(x2)
    assert out2.shape == ref2.shape and out2.dtype == ref2.dtype
    assert jnp.allclose(out2, ref2, atol=1e-5, rtol=1e-5)

    print("KERNEL_OK")
</pallas_src>

<mosaic_0001>
module attributes {stable_mosaic.version = 11 : i64} {
  func.func @_normalize_rows_kernel(%arg0: i32, %arg1: memref<8x256xf32, #tpu.memory_space<vmem>>, %arg2: memref<8x256xf32, #tpu.memory_space<vmem>>) attributes {dimension_semantics = [#tpu.dimension_semantics<parallel>], iteration_bounds = array<i64: 1>, scalar_prefetch = 0 : i64, scratch_operands = 0 : i64, tpu.core_type = #tpu.core_type<tc>, window_params = [{transform_indices = @transform_0, window_bounds = array<i64: 8, 256>}, {transform_indices = @transform_1, window_bounds = array<i64: 8, 256>}]} {
    %c0 = arith.constant 0 : index
    %c0_0 = arith.constant 0 : index
    %0 = vector.load %arg1[%c0, %c0_0] : memref<8x256xf32, #tpu.memory_space<vmem>>, vector<8x256xf32>
    %1 = math.absf %0 : vector<8x256xf32>
    %cst = arith.constant dense<0x7F800000> : vector<8xf32>
    %2 = vector.multi_reduction <minimumf>, %1, %cst [1] : vector<8x256xf32> to vector<8xf32>
    %3 = vector.shape_cast %2 : vector<8xf32> to vector<8x1xf32>
    %cst_1 = arith.constant dense<0xFF800000> : vector<8xf32>
    %4 = vector.multi_reduction <maximumf>, %1, %cst_1 [1] : vector<8x256xf32> to vector<8xf32>
    %5 = vector.shape_cast %4 : vector<8xf32> to vector<8x1xf32>
    %6 = arith.subf %5, %3 : vector<8x1xf32>
    %cst_2 = arith.constant 9.99999993E-9 : f32
    %7 = vector.broadcast %cst_2 : f32 to vector<8x1xf32>
    %8 = arith.addf %6, %7 : vector<8x1xf32>
    %9 = tpu.reciprocal %8 : vector<8x1xf32> -> vector<8x1xf32>
    %10 = vector.broadcast %3 : vector<8x1xf32> to vector<8x256xf32>
    %11 = arith.subf %0, %10 : vector<8x256xf32>
    %12 = vector.broadcast %9 : vector<8x1xf32> to vector<8x256xf32>
    %13 = arith.mulf %11, %12 : vector<8x256xf32>
    %c0_3 = arith.constant 0 : index
    %c0_4 = arith.constant 0 : index
    %14 = vector.load %arg2[%c0_3, %c0_4] : memref<8x256xf32, #tpu.memory_space<vmem>>, vector<8x256xf32>
    tpu.vector_store %arg2[%c0_3, %c0_4], %13 {strides = array<i32>} : memref<8x256xf32, #tpu.memory_space<vmem>>, vector<8x256xf32>,
    return
  }
  func.func @transform_0(%arg0: i32) -> (i32, i32) {
    %c0_i32 = arith.constant 0 : i32
    %c0_i32_0 = arith.constant 0 : i32
    return %arg0, %c0_i32 : i32, i32
  }
  func.func @transform_1(%arg0: i32) -> (i32, i32) {
    %c0_i32 = arith.constant 0 : i32
    %c0_i32_0 = arith.constant 0 : i32
    return %arg0, %c0_i32 : i32, i32
  }
}

</mosaic_0001>

<bundles_post_ra>
// kernel: tpu_custom_call.1
= control target key start
LH: loop header
LB: loop body
LE: loop exit
PB: predicated region body
PF: predicated region fallthrough
CT: control target
= control target key end

     0   :  { %6 = vsyncpa [#allocation3], 0  ;;  %s143_s0 = inlined_call_operand.hbm [shape: f32[8,256], index: 0, kind: input, shape index: {}]   ;;  %s144_s1 = inlined_call_operand.hbm [shape: f32[8,256], index: 1, kind: output, shape index: {}]  }
   0x1   :  { %7 = vsyncpa [#allocation4], 0  ;;  %s107_s6 = smov [#allocation2]   ;;  %s59_s10 = scalar_lea.hbm %s143_s0, 256 }
   0x2   :  { %s14_s7 = sshll.u32 %s107_s6, 4  ;;  %p60_p0 = scmp.ne.s32.totalorder %s143_s0, %s59_s10  ;;  %s15_s7 = int_to_ptr.vmem [resolvable:$true] %s14_s7 }
   0x3   :  { %p63_p1 = scmp.lt.u32.totalorder %s59_s10, %s143_s0 }
   0x5   :  { %p65_p2 = pnand %p63_p1, %p60_p0 }
   0x7   :  { %68 = shalt.err (!%p65_p2)
}
   0x8   :  { %s69_s15 = scalar_lea.vmem %s15_s7, 256  ;;  %p74_p4 = scmp.lt.s32.totalorder %s15_s7, %s15_s7 }
   0x9   :  { %p70_p3 = scmp.ne.s32.totalorder %s15_s7, %s69_s15  ;;  %p75_p5 = scmp.lt.s32.totalorder %s69_s15, %s69_s15 }
   0xb   :  { %p76_p6 = por %p75_p5, %p74_p4 }
   0xd   :  { %p77_p7 = pnand %p76_p6, %p70_p3 }
   0xf   :  { %80 = shalt.err (!%p77_p7)
}
  0x10   :  { %17 = dma.hbm_to_vmem [thread:$0]  %s143_s0, 256, %s15_s7, [#allocation3]  }
  0x11   :  { %103 = dma.done.wait [#allocation3], 256  }
  0x12   :  { %104 = vsyncadd [#allocation3], 4294967040  ;;  %v21_v0 = vld [vmem:[#allocation2] sm:$0xff]  ;;  %v22_v1 = vld [vmem:[#allocation2 + $0x8] sm:$0xff]  ;;  %s108_s18 = smov [#allocation5]  }
  0x13   :  { %v23_v2 = vand.u32 2147483647, %v21_v0  ;;  %v24_v3 = vand.u32 2147483647, %v22_v1  ;;  %s46_s19 = sshll.u32 %s108_s18, 4  ;;  %s47_s19 = int_to_ptr.vmem [resolvable:$true] %s46_s19 }
  0x14   :  { %s81_s0 = scalar_lea.vmem %s47_s19, 256  ;;  %p86_p9 = scmp.lt.s32.totalorder %s47_s19, %s47_s19 }
  0x15   :  { %v25_v4 = vmin.f32 %v23_v2, %v24_v3  ;;  %v28_v5 = vmax.f32 %v23_v2, %v24_v3  ;;  %p82_p8 = scmp.ne.s32.totalorder %s47_s19, %s81_s0  ;;  %p87_p10 = scmp.lt.s32.totalorder %s81_s0, %s81_s0 }
  0x17   :  { %26 = vmin.xlane.f32.xlu0 %v25_v4  ;;  %p88_p11 = por %p87_p10, %p86_p9 }
  0x19   :  { %p89_p12 = pnand %p88_p11, %p82_p8 }
  0x1b   :  { %29 = vmax.xlane.f32.xlu0 %v28_v5 }
  0xa4   :  { %v27_v6 = vpop.xlane.xlu0 %26 }
  0xa5   :  { %v34_v10 = vsub.f32 %v21_v0, %v27_v6  ;;  %v35_v11 = vsub.f32 %v22_v1, %v27_v6 }
  0xa8   :  { %v30_v7 = vpop.xlane.xlu0 %29 }
  0xa9   :  { %v31_v8 = vsub.f32 %v30_v7, %v27_v6 }
  0xab   :  { %v32_v9 = vadd.f32 1e-08, %v31_v8 }
  0xad   :  { %57 = vrcp.f32 %v32_v9 }
  0xb7   :  { %v58_v12 = vpop.eup %57 }
  0xb8   :  { %v36_v13 = vmul.f32 %v58_v12, %v34_v10  ;;  %v37_v14 = vmul.f32 %v58_v12, %v35_v11 }
  0xba   :  { %38 = vst [vmem:[#allocation5] sm:$0xff] %v36_v13  ;;  %39 = vst [vmem:[#allocation5 + $0x8] sm:$0xff] %v37_v14 }
  0xbb   :  { %92 = shalt.err (!%p89_p12)
}
  0xbc   :  { %s93_s22 = scalar_lea.hbm %s144_s1, 256 }
  0xbd   :  { %p94_p13 = scmp.ne.s32.totalorder %s144_s1, %s93_s22  ;;  %p97_p0 = scmp.lt.u32.totalorder %s93_s22, %s144_s1 }
  0xbf   :  { %p99_p1 = pnand %p97_p0, %p94_p13 }
  0xc1   :  { %102 = shalt.err (!%p99_p1)
}
  0xc2   :  { %49 = dma.vmem_to_hbm [thread:$0]  %s47_s19, 256, %s144_s1, [#allocation4]  }
  0xc3   :  { %105 = dma.done.wait [#allocation4], 256  }
  0xc4   :  { %106 = vsyncadd [#allocation4], 4294967040 }
  0xc5   :  { %53 = vsyncpa [#allocation3], 1 }
  0xc6   :  { %54 = vsyncpa [#allocation4], 1 }

</bundles_post_ra>
